<compile_context>
chip_gen: v5e
topology: v5e:2x2
jax: 0.10.0
libtpu: 0.0.40
codegen_flags: <defaults>
</compile_context>

<pallas_src>
import jax
import jax.numpy as jnp
from jax.experimental import pallas as pl
from jax.experimental.pallas import tpu as pltpu


def sage_pass1_kernel(adj_ref, xf_ref, xt_ref, wl1_ref, wr1_ref, b1_ref,
                      w2cat_ref, b2_ref, hw_ref, hskip_ref):
    cout = hw_ref.shape[-1]

    # Layer-1 mean aggregation: the dominant [TM, N] x [N, cin] MXU matmul.
    # adj rows are already bf16; cast x to bf16 too so the MXU runs its native
    # bf16 path, accumulating in f32.
    agg1 = jnp.dot(adj_ref[...], xf_ref[...].astype(jnp.bfloat16),
                   preferred_element_type=jnp.float32)                 # (TM, cin)

    # SAGEConv1: lin_l(agg) + lin_r(x_i) + b1, then ReLU.
    # (A fused [agg | x] @ W1cat was evaluated; at cin=8 the in-kernel lane
    #  concat relayout costs about what the saved MXU launch is worth, so the
    #  two tiny projections stay separate.)
    h = (jnp.dot(agg1, wl1_ref[...], preferred_element_type=jnp.float32)
         + jnp.dot(xt_ref[...], wr1_ref[...], preferred_element_type=jnp.float32)
         + b1_ref[...])
    h = jnp.maximum(h, 0.0)                                            # relu

    # TODO(synk): F.dropout(p=0.5, training=self.training) is identity in eval
    # mode; training-mode torch-RNG dropout has no exact Pallas equivalent.

    # SAGEConv2 projections applied BEFORE the second aggregation (cout < hidden),
    # fused into one matmul:  p = h @ [wl2 | wr2].
    p = jnp.dot(h, w2cat_ref[...], preferred_element_type=jnp.float32)  # (TM, 2*cout)
    hw_ref[...] = p[:, :cout]                       # aggregated in pass 2
    hskip_ref[...] = p[:, cout:] + b2_ref[...]      # per-node skip term + bias


def sage_pass2_kernel(adj_ref, hw_ref, hskip_ref, out_ref):
    # Second aggregation, reordered to width cout:  out = adj @ (h @ wl2) + skip.
    agg2 = jnp.dot(adj_ref[...], hw_ref[...].astype(jnp.bfloat16),
                   preferred_element_type=jnp.float32)
    out_ref[...] = (agg2 + hskip_ref[...]).astype(out_ref.dtype)


def build_mean_adjacency(edge_index, num_nodes):
    """Dense mean-aggregation matrix from an edge_index [2, E] (src, dst)."""
    src, dst = edge_index[0], edge_index[1]
    a = jnp.zeros((num_nodes, num_nodes), jnp.float32).at[dst, src].add(1.0)
    deg = a.sum(axis=1, keepdims=True)
    return a / jnp.maximum(deg, 1.0)  # nodes with no in-edges -> zero row (agg = 0)


def gnn_forward(x, edge_index, params, *, tile_m=128):
    n, cin = x.shape
    wl1, wr1, b1 = params["wl1"], params["wr1"], params["b1"]
    wl2, wr2, b2 = params["wl2"], params["wr2"], params["b2"]
    hidden = wl1.shape[1]
    cout = wl2.shape[1]

    # The adjacency is the only O(N^2) array -> store / stream it in bf16
    # (halves HBM traffic and VMEM footprint; values are 1/deg, error ~2^-8).
    # TODO(synk): for realistic graphs (E << N^2) a block-sparse / gathered
    # neighbour formulation driven by PrefetchScalarGridSpec should replace
    # this dense mean-aggregation matrix.
    adj = build_mean_adjacency(edge_index, n).astype(jnp.bfloat16)

    # Fused layer-2 projection weights: h @ [wl2 | wr2].
    w2cat = jnp.concatenate([wl2, wr2], axis=1)

    # Node-row tile size (bf16 sublane tiling wants multiples of 16).
    tm = tile_m if (n % tile_m == 0 and tile_m % 16 == 0) else n
    grid = (n // tm,)
    parallel = pltpu.CompilerParams(dimension_semantics=("parallel",))

    def resident(shape):
        return pl.BlockSpec(shape, lambda i: (0,) * len(shape))

    def row_tile(shape):
        return pl.BlockSpec(shape, lambda i: (i,) + (0,) * (len(shape) - 1))

    # ---- pass 1: SAGEConv1 + relu + layer-2 projections, per node-row tile ----
    hw, hskip = pl.pallas_call(
        sage_pass1_kernel,
        out_shape=(jax.ShapeDtypeStruct((n, cout), jnp.float32),
                   jax.ShapeDtypeStruct((n, cout), jnp.float32)),
        grid=grid,
        in_specs=[
            row_tile((tm, n)),             # adj row tile (bf16)
            resident((n, cin)),            # x (full, rhs of aggregation)
            row_tile((tm, cin)),           # x row tile (for lin_r)
            resident((cin, hidden)),       # wl1 (stored [in, out])
            resident((cin, hidden)),       # wr1
            resident((1, hidden)),         # b1
            resident((hidden, 2 * cout)),  # [wl2 | wr2]
            resident((1, cout)),           # b2
        ],
        out_specs=(row_tile((tm, cout)), row_tile((tm, cout))),
        compiler_params=parallel,
    )(adj, x, x, wl1, wr1, b1, w2cat, b2)

    # ---- pass 2: second (reordered) aggregation at width cout ----
    # Note: cout < 128, so output stores are masked partial stores; lane-dense
    # padding of the output was deemed not worth the extra plumbing here.
    out = pl.pallas_call(
        sage_pass2_kernel,
        out_shape=jax.ShapeDtypeStruct((n, cout), jnp.float32),
        grid=grid,
        in_specs=[
            row_tile((tm, n)),       # adj row tile (bf16)
            resident((n, cout)),     # hw = h @ wl2 (full, rhs of aggregation)
            row_tile((tm, cout)),    # hskip = h @ wr2 + b2
        ],
        out_specs=row_tile((tm, cout)),
        compiler_params=parallel,
    )(adj, hw, hskip)
    return out


def init_params(key, in_channels, hidden_channels, out_channels):
    ks = jax.random.split(key, 6)

    def lin(k, fan_in, fan_out):
        bound = 1.0 / jnp.sqrt(jnp.float32(fan_in))
        return jax.random.uniform(k, (fan_in, fan_out), jnp.float32, -bound, bound)

    return {
        "wl1": lin(ks[0], in_channels, hidden_channels),
        "wr1": lin(ks[1], in_channels, hidden_channels),
        "b1":  jax.random.uniform(ks[4], (1, hidden_channels), jnp.float32, -0.1, 0.1),
        "wl2": lin(ks[2], hidden_channels, out_channels),
        "wr2": lin(ks[3], hidden_channels, out_channels),
        "b2":  jax.random.uniform(ks[5], (1, out_channels), jnp.float32, -0.1, 0.1),
    }


if __name__ == "__main__":
    key = jax.random.PRNGKey(0)
    k_x, k_e, k_p = jax.random.split(key, 3)

    num_nodes = 256
    in_channels, hidden_channels, out_channels = 8, 32, 8
    num_edges = 1024

    x = jax.random.normal(k_x, (num_nodes, in_channels), jnp.float32)
    edge_index = jax.random.randint(k_e, (2, num_edges), 0, num_nodes, jnp.int32)
    params = init_params(k_p, in_channels, hidden_channels, out_channels)

    out = gnn_forward(x, edge_index, params, tile_m=128)
    out = jax.block_until_ready(out)
    assert out.shape == (num_nodes, out_channels)

    # Pure-f32 JAX reference of the same math (kernel uses bf16 adjacency
    # operands, so tolerance is loosened accordingly).
    adj_f32 = build_mean_adjacency(edge_index, num_nodes)
    h_ref = jnp.maximum(adj_f32 @ x @ params["wl1"] + x @ params["wr1"] + params["b1"], 0.0)
    ref = adj_f32 @ h_ref @ params["wl2"] + h_ref @ params["wr2"] + params["b2"]
    max_err = float(jnp.abs(out - ref).max())
    assert jnp.allclose(out, ref, atol=5e-2, rtol=5e-2), f"max abs err = {max_err}"

    print("KERNEL_OK")
</pallas_src>

<mosaic_0001>
module attributes {stable_mosaic.version = 11 : i64} {
  func.func @sage_pass1_kernel(%arg0: i32, %arg1: memref<128x256xbf16, #tpu.memory_space<vmem>>, %arg2: memref<256x8xf32, #tpu.memory_space<vmem>>, %arg3: memref<128x8xf32, #tpu.memory_space<vmem>>, %arg4: memref<8x32xf32, #tpu.memory_space<vmem>>, %arg5: memref<8x32xf32, #tpu.memory_space<vmem>>, %arg6: memref<1x32xf32, #tpu.memory_space<vmem>>, %arg7: memref<32x16xf32, #tpu.memory_space<vmem>>, %arg8: memref<1x8xf32, #tpu.memory_space<vmem>>, %arg9: memref<128x8xf32, #tpu.memory_space<vmem>>, %arg10: memref<128x8xf32, #tpu.memory_space<vmem>>) attributes {dimension_semantics = [#tpu.dimension_semantics<parallel>], iteration_bounds = array<i64: 2>, scalar_prefetch = 0 : i64, scratch_operands = 0 : i64, tpu.core_type = #tpu.core_type<tc>, window_params = [{transform_indices = @transform_0, window_bounds = array<i64: 128, 256>}, {pipeline_mode = #tpu.pipeline_mode<synchronous>, transform_indices = @transform_1, window_bounds = array<i64: 256, 8>}, {transform_indices = @transform_2, window_bounds = array<i64: 128, 8>}, {pipeline_mode = #tpu.pipeline_mode<synchronous>, transform_indices = @transform_3, window_bounds = array<i64: 8, 32>}, {pipeline_mode = #tpu.pipeline_mode<synchronous>, transform_indices = @transform_4, window_bounds = array<i64: 8, 32>}, {pipeline_mode = #tpu.pipeline_mode<synchronous>, transform_indices = @transform_5, window_bounds = array<i64: 1, 32>}, {pipeline_mode = #tpu.pipeline_mode<synchronous>, transform_indices = @transform_6, window_bounds = array<i64: 32, 16>}, {pipeline_mode = #tpu.pipeline_mode<synchronous>, transform_indices = @transform_7, window_bounds = array<i64: 1, 8>}, {transform_indices = @transform_8, window_bounds = array<i64: 128, 8>}, {transform_indices = @transform_9, window_bounds = array<i64: 128, 8>}]} {
    %c0 = arith.constant 0 : index
    %c0_0 = arith.constant 0 : index
    %0 = vector.load %arg1[%c0, %c0_0] : memref<128x256xbf16, #tpu.memory_space<vmem>>, vector<128x256xbf16>
    %c0_1 = arith.constant 0 : index
    %c0_2 = arith.constant 0 : index
    %1 = vector.load %arg2[%c0_1, %c0_2] : memref<256x8xf32, #tpu.memory_space<vmem>>, vector<256x8xf32>
    %2 = arith.truncf %1 : vector<256x8xf32> to vector<256x8xbf16>
    %cst = arith.constant dense<0.000000e+00> : vector<128x8xf32>
    %3 = tpu.matmul %0, %2, %cst {dimension_numbers = #tpu.dot_dimension_numbers<[1], [0], [0], [1], [0, 0, 1, 1], [], []>} : vector<128x256xbf16>, vector<256x8xbf16>, vector<128x8xf32> -> vector<128x8xf32>
    %c0_3 = arith.constant 0 : index
    %c0_4 = arith.constant 0 : index
    %4 = vector.load %arg4[%c0_3, %c0_4] : memref<8x32xf32, #tpu.memory_space<vmem>>, vector<8x32xf32>
    %cst_5 = arith.constant dense<0.000000e+00> : vector<128x32xf32>
    %5 = tpu.matmul %3, %4, %cst_5 {dimension_numbers = #tpu.dot_dimension_numbers<[1], [0], [0], [1], [0, 0, 1, 1], [], []>} : vector<128x8xf32>, vector<8x32xf32>, vector<128x32xf32> -> vector<128x32xf32>
    %c0_6 = arith.constant 0 : index
    %c0_7 = arith.constant 0 : index
    %6 = vector.load %arg3[%c0_6, %c0_7] : memref<128x8xf32, #tpu.memory_space<vmem>>, vector<128x8xf32>
    %c0_8 = arith.constant 0 : index
    %c0_9 = arith.constant 0 : index
    %7 = vector.load %arg5[%c0_8, %c0_9] : memref<8x32xf32, #tpu.memory_space<vmem>>, vector<8x32xf32>
    %cst_10 = arith.constant dense<0.000000e+00> : vector<128x32xf32>
    %8 = tpu.matmul %6, %7, %cst_10 {dimension_numbers = #tpu.dot_dimension_numbers<[1], [0], [0], [1], [0, 0, 1, 1], [], []>} : vector<128x8xf32>, vector<8x32xf32>, vector<128x32xf32> -> vector<128x32xf32>
    %9 = arith.addf %5, %8 : vector<128x32xf32>
    %c0_11 = arith.constant 0 : index
    %c0_12 = arith.constant 0 : index
    %10 = vector.load %arg6[%c0_11, %c0_12] : memref<1x32xf32, #tpu.memory_space<vmem>>, vector<1x32xf32>
    %11 = vector.broadcast %10 : vector<1x32xf32> to vector<128x32xf32>
    %12 = arith.addf %9, %11 : vector<128x32xf32>
    %cst_13 = arith.constant 0.000000e+00 : f32
    %13 = vector.broadcast %cst_13 : f32 to vector<128x32xf32>
    %14 = arith.maximumf %12, %13 : vector<128x32xf32>
    %c0_14 = arith.constant 0 : index
    %c0_15 = arith.constant 0 : index
    %15 = vector.load %arg7[%c0_14, %c0_15] : memref<32x16xf32, #tpu.memory_space<vmem>>, vector<32x16xf32>
    %cst_16 = arith.constant dense<0.000000e+00> : vector<128x16xf32>
    %16 = tpu.matmul %14, %15, %cst_16 {dimension_numbers = #tpu.dot_dimension_numbers<[1], [0], [0], [1], [0, 0, 1, 1], [], []>} : vector<128x32xf32>, vector<32x16xf32>, vector<128x16xf32> -> vector<128x16xf32>
    %17 = vector.extract_strided_slice %16 {offsets = [0, 0], sizes = [128, 8], strides = [1, 1]} : vector<128x16xf32> to vector<128x8xf32>
    %c0_17 = arith.constant 0 : index
    %c0_18 = arith.constant 0 : index
    %18 = vector.load %arg9[%c0_17, %c0_18] : memref<128x8xf32, #tpu.memory_space<vmem>>, vector<128x8xf32>
    tpu.vector_store %arg9[%c0_17, %c0_18], %17 {strides = array<i32>} : memref<128x8xf32, #tpu.memory_space<vmem>>, vector<128x8xf32>,
    %19 = vector.extract_strided_slice %16 {offsets = [0, 8], sizes = [128, 8], strides = [1, 1]} : vector<128x16xf32> to vector<128x8xf32>
    %c0_19 = arith.constant 0 : index
    %c0_20 = arith.constant 0 : index
    %20 = vector.load %arg8[%c0_19, %c0_20] : memref<1x8xf32, #tpu.memory_space<vmem>>, vector<1x8xf32>
    %21 = vector.broadcast %20 : vector<1x8xf32> to vector<128x8xf32>
    %22 = arith.addf %19, %21 : vector<128x8xf32>
    %c0_21 = arith.constant 0 : index
    %c0_22 = arith.constant 0 : index
    %23 = vector.load %arg10[%c0_21, %c0_22] : memref<128x8xf32, #tpu.memory_space<vmem>>, vector<128x8xf32>
    tpu.vector_store %arg10[%c0_21, %c0_22], %22 {strides = array<i32>} : memref<128x8xf32, #tpu.memory_space<vmem>>, vector<128x8xf32>,
    return
  }
  func.func @transform_0(%arg0: i32) -> (i32, i32) {
    %c0_i32 = arith.constant 0 : i32
    %c0_i32_0 = arith.constant 0 : i32
    return %arg0, %c0_i32 : i32, i32
  }
  func.func @transform_1(%arg0: i32) -> (i32, i32) {
    %c0_i32 = arith.constant 0 : i32
    %c0_i32_0 = arith.constant 0 : i32
    %c0_i32_1 = arith.constant 0 : i32
    return %c0_i32, %c0_i32_0 : i32, i32
  }
  func.func @transform_2(%arg0: i32) -> (i32, i32) {
    %c0_i32 = arith.constant 0 : i32
    %c0_i32_0 = arith.constant 0 : i32
    return %arg0, %c0_i32 : i32, i32
  }
  func.func @transform_3(%arg0: i32) -> (i32, i32) {
    %c0_i32 = arith.constant 0 : i32
    %c0_i32_0 = arith.constant 0 : i32
    %c0_i32_1 = arith.constant 0 : i32
    return %c0_i32, %c0_i32_0 : i32, i32
  }
  func.func @transform_4(%arg0: i32) -> (i32, i32) {
    %c0_i32 = arith.constant 0 : i32
    %c0_i32_0 = arith.constant 0 : i32
    %c0_i32_1 = arith.constant 0 : i32
    return %c0_i32, %c0_i32_0 : i32, i32
  }
  func.func @transform_5(%arg0: i32) -> (i32, i32) {
    %c0_i32 = arith.constant 0 : i32
    %c0_i32_0 = arith.constant 0 : i32
    %c0_i32_1 = arith.constant 0 : i32
    return %c0_i32, %c0_i32_0 : i32, i32
  }
  func.func @transform_6(%arg0: i32) -> (i32, i32) {
    %c0_i32 = arith.constant 0 : i32
    %c0_i32_0 = arith.constant 0 : i32
    %c0_i32_1 = arith.constant 0 : i32
    return %c0_i32, %c0_i32_0 : i32, i32
  }
  func.func @transform_7(%arg0: i32) -> (i32, i32) {
    %c0_i32 = arith.constant 0 : i32
    %c0_i32_0 = arith.constant 0 : i32
    %c0_i32_1 = arith.constant 0 : i32
    return %c0_i32, %c0_i32_0 : i32, i32
  }
  func.func @transform_8(%arg0: i32) -> (i32, i32) {
    %c0_i32 = arith.constant 0 : i32
    %c0_i32_0 = arith.constant 0 : i32
    return %arg0, %c0_i32 : i32, i32
  }
  func.func @transform_9(%arg0: i32) -> (i32, i32) {
    %c0_i32 = arith.constant 0 : i32
    %c0_i32_0 = arith.constant 0 : i32
    return %arg0, %c0_i32 : i32, i32
  }
}

</mosaic_0001>

<bundles_post_ra>
// kernel: tpu_custom_call.1
= control target key start
LH: loop header
LB: loop body
LE: loop exit
PB: predicated region body
PF: predicated region fallthrough
CT: control target
= control target key end

     0   :  { %s1456_s30 = smov 0   ;;  %s1845_s0 = inlined_call_operand.vmem [shape: bf16[256,256], index: 0, kind: input, shape index: {}]   ;;  %s1846_s1 = inlined_call_operand.vmem [shape: f32[256,8], index: 1, kind: input, shape index: {}]   ;;  %s1847_s2 = inlined_call_operand.vmem [shape: f32[256,8], index: 2, kind: input, shape index: {}]   ;;  %s1848_s3 = inlined_call_operand.vmem [shape: f32[8,32], index: 3, kind: input, shape index: {}]   ;;  %s1849_s4 = inlined_call_operand.vmem [shape: f32[8,32], index: 4, kind: input, shape index: {}]   ;;  %s1850_s5 = inlined_call_operand.vmem [shape: f32[1,32], index: 5, kind: input, shape index: {}]   ;;  %s1851_s6 = inlined_call_operand.vmem [shape: f32[32,16], index: 6, kind: input, shape index: {}]   ;;  %s1852_s7 = inlined_call_operand.vmem [shape: f32[1,8], index: 7, kind: input, shape index: {}]   ;;  %s1853_s8 = inlined_call_operand.vmem [shape: f32[256,8], index: 8, kind: output, shape index: {0}]   ;;  %s1854_s9 = inlined_call_operand.vmem [shape: f32[256,8], index: 9, kind: output, shape index: {1}]  }
   0x1 LB: > { %s1236_s10 = sadd.s32 4294967295, %s1402_s30   ;;  %p1240_p0 = scmp.ge.s32.totalorder %s1402_s30, 1  ;;  %s1402_s30 = sphi %s1456_s30, %s20_s30  }
   0x2   : > { %p303_p1 = scmp.lt.s32.totalorder %s1402_s30, 3 }
   0x4   : > { %p304_p2 = pnand %p1240_p0, %p303_p1 }
   0x5   : > { %s1241_s24 = sshll.u32 (!%p304_p2), %s1236_s10, 4 }
   0x6   : > { %307 = sbr.rel (%p304_p2) target bundleno = 682 (0x2aa), region = 52  ;;  %p351_p3 = scmp.lt.s32.totalorder (!%p304_p2), %s1241_s24, 31 }
   0xb   : > { %v405_v0 = vld [vmem:[%s1846_s1 + $0x70] sm:$0xff]  ;;  %v406_v1 = vld [vmem:[%s1846_s1 + $0x78] sm:$0xff]  ;;  %v403_v5 = vld [vmem:[%s1846_s1 + $0x60] sm:$0xff]  ;;  %s1856_s24 = smov (!%p351_p3, %s1241_s24), 31  ;;  %vm635_vm0 = vcmask 64512   ;;  %vm902_vm1 = vcmask 261120  }
   0xc   : > { %v421_v2 = vld [vmem:[%s1846_s1 + $0xf0] sm:$0xff]  ;;  %v430_v3 = vpack.c.bf16 %v406_v1, %v405_v0  ;;  %v422_v4 = vld [vmem:[%s1846_s1 + $0xf8] sm:$0xff]  ;;  %v404_v6 = vld [vmem:[%s1846_s1 + $0x68] sm:$0xff]  ;;  %s1553_s13 = sshll.u32 %s1856_s24, 3  ;;  %s1404_s24 = smov 8  }
   0xd   : > { %v438_v7 = vpack.c.bf16 %v422_v4, %v421_v2  ;;  %v419_v8 = vld [vmem:[%s1846_s1 + $0xe0] sm:$0xff]  ;;  %v420_v9 = vld [vmem:[%s1846_s1 + $0xe8] sm:$0xff]  ;;  %v429_v10 = vpack.c.bf16 %v404_v6, %v403_v5  ;;  %v401_v12 = vld [vmem:[%s1846_s1 + $0x50] sm:$0xff]  ;;  %s1565_s19 = scalar_lea.vmem %s1845_s0, %s1553_s13  ;;  %s1593_s26 = scalar_lea.vmem %s1847_s2, %s1553_s13 }
   0xe   : > { %519 = vmatpush.bf16.msra.mxu0 %v430_v3  ;;  %v437_v11 = vpack.c.bf16 %v420_v9, %v419_v8  ;;  %v402_v13 = vld [vmem:[%s1846_s1 + $0x58] sm:$0xff]  ;;  %v417_v14 = vld [vmem:[%s1846_s1 + $0xd0] sm:$0xff]  ;;  %v399_v18 = vld [vmem:[%s1846_s1 + $0x40] sm:$0xff]  ;;  %s1738_s25 = scalar_lea.vmem %s1853_s8, %s1553_s13  ;;  %s1804_s29 = scalar_lea.vmem %s1854_s9, %s1553_s13 }
   0xf   : > { %568 = vmatpush.bf16.msra.mxu1 %v438_v7  ;;  %v418_v15 = vld [vmem:[%s1846_s1 + $0xd8] sm:$0xff]  ;;  %v428_v16 = vpack.c.bf16 %v402_v13, %v401_v12  ;;  %v400_v19 = vld [vmem:[%s1846_s1 + $0x48] sm:$0xff]  ;;  %v415_v20 = vld [vmem:[%s1846_s1 + $0xc0] sm:$0xff] }
  0x10   : > { %v436_v17 = vpack.c.bf16 %v418_v15, %v417_v14  ;;  %v416_v21 = vld [vmem:[%s1846_s1 + $0xc8] sm:$0xff]  ;;  %v427_v22 = vpack.c.bf16 %v400_v19, %v399_v18  ;;  %v397_v23 = vld [vmem:[%s1846_s1 + $0x30] sm:$0xff]  ;;  %v398_v25 = vld [vmem:[%s1846_s1 + $0x38] sm:$0xff] }
  0x11   : > { %v435_v24 = vpack.c.bf16 %v416_v21, %v415_v20  ;;  %v413_v26 = vld [vmem:[%s1846_s1 + $0xb0] sm:$0xff]  ;;  %v634_v27 = vld [vmem:[%s1849_s4] sm:$0xff]  ;;  %v414_v28 = vld [vmem:[%s1846_s1 + $0xb8] sm:$0xff]  ;;  %v426_v29 = vpack.c.bf16 %v398_v25, %v397_v23 }
  0x12   : > { %520 = vmatpush.bf16.msra.mxu0 %v429_v10  ;;  %1383 = vmatpush.msra.mxu3 %v634_v27  ;;  %v434_v30 = vpack.c.bf16 %v414_v28, %v413_v26  ;;  %v395_v31 = vld [vmem:[%s1846_s1 + $0x20] sm:$0xff]  ;;  %v396_v32 = vld [vmem:[%s1846_s1 + $0x28] sm:$0xff]  ;;  %v393_v37 = vld [vmem:[%s1846_s1 + $0x10] sm:$0xff] }
  0x13   : > { %569 = vmatpush.bf16.msra.mxu1 %v437_v11  ;;  %1382 = vmatpush.msra.mxu2 %v634_v27  ;;  %v411_v33 = vld [vmem:[%s1846_s1 + $0xa0] sm:$0xff]  ;;  %v412_v34 = vld [vmem:[%s1846_s1 + $0xa8] sm:$0xff]  ;;  %v425_v35 = vpack.c.bf16 %v396_v32, %v395_v31  ;;  %v394_v38 = vld [vmem:[%s1846_s1 + $0x18] sm:$0xff] }
  0x14   : > { %v433_v36 = vpack.c.bf16 %v412_v34, %v411_v33  ;;  %v409_v39 = vld [vmem:[%s1846_s1 + $0x90] sm:$0xff]  ;;  %v410_v40 = vld [vmem:[%s1846_s1 + $0x98] sm:$0xff]  ;;  %v424_v41 = vpack.c.bf16 %v394_v38, %v393_v37  ;;  %v391_v43 = vld [vmem:[%s1846_s1] sm:$0xff] }
  0x15   : > { %v432_v42 = vpack.c.bf16 %v410_v40, %v409_v39  ;;  %v392_v44 = vld [vmem:[%s1846_s1 + $0x8] sm:$0xff]  ;;  %v407_v45 = vld [vmem:[%s1846_s1 + $0x80] sm:$0xff]  ;;  %v1260_v55 = vld [vmem:[%s1565_s19 + $0x10] sm:$0xf] }
  0x16   : > { %521 = vmatpush.bf16.msra.mxu0 %v428_v16  ;;  %v408_v46 = vld [vmem:[%s1846_s1 + $0x88] sm:$0xff]  ;;  %v423_v47 = vpack.c.bf16 %v392_v44, %v391_v43  ;;  %v1252_v48 = vld [vmem:[%s1565_s19] sm:$0xf]  ;;  %v1365_v51 = vld [vmem:[%s1565_s19 + $0x4] sm:$0xf] }
  0x17   : > { %570 = vmatpush.bf16.msra.mxu1 %v436_v17  ;;  %v1366_v49 = vld [vmem:[%s1565_s19 + $0x4] sm:$0xf0]  ;;  %v431_v50 = vpack.c.bf16 %v408_v46, %v407_v45  ;;  %v1254_v52 = vld [vmem:[%s1565_s19 + $0x8] sm:$0xf0]  ;;  %v1368_v56 = vld [vmem:[%s1565_s19 + $0x14] sm:$0xf0] }
  0x18   : > { %v1253_v53 = vor.u32 %v1366_v49, %v1252_v48  ;;  %v1257_v54 = vor.u32 %v1365_v51, %v1254_v52  ;;  %v1367_v57 = vld [vmem:[%s1565_s19 + $0x14] sm:$0xf]  ;;  %v1262_v58 = vld [vmem:[%s1565_s19 + $0x18] sm:$0xf0]  ;;  %v1261_v59 = vor.u32 %v1368_v56, %v1260_v55  ;;  %v1268_v61 = vld [vmem:[%s1565_s19 + $0x20] sm:$0xf] }
  0x19   : > { %v1265_v60 = vor.u32 %v1367_v57, %v1262_v58  ;;  %v1370_v62 = vld [vmem:[%s1565_s19 + $0x24] sm:$0xf0]  ;;  %v1369_v63 = vld [vmem:[%s1565_s19 + $0x24] sm:$0xf]  ;;  %v1270_v0 = vld [vmem:[%s1565_s19 + $0x28] sm:$0xf0] }
  0x1a   : > { %522 = vmatpush.bf16.msra.mxu0 %v427_v22  ;;  %v1269_v1 = vor.u32 %v1370_v62, %v1268_v61  ;;  %v1273_v2 = vor.u32 %v1369_v63, %v1270_v0  ;;  %v1276_v3 = vld [vmem:[%s1565_s19 + $0x30] sm:$0xf]  ;;  %v1372_v4 = vld [vmem:[%s1565_s19 + $0x34] sm:$0xf0]  ;;  %v1371_v5 = vld [vmem:[%s1565_s19 + $0x34] sm:$0xf] }
  0x1b   : > { %571 = vmatpush.bf16.msra.mxu1 %v435_v24  ;;  %v1278_v6 = vld [vmem:[%s1565_s19 + $0x38] sm:$0xf0]  ;;  %v1277_v7 = vor.u32 %v1372_v4, %v1276_v3  ;;  %v628_v9 = vld [vmem:[%s1593_s26 + $0x50] sm:$0xff]  ;;  %v617_v10 = vld [vmem:[%s1848_s3] sm:$0xff] }
  0x1c   : > { %v1281_v8 = vor.u32 %v1371_v5, %v1278_v6  ;;  %1324 = vmatmul.msk.f32.vlgmr.msra.gmra.mxu3 %vm635_vm0, %v628_v9  ;;  %v629_v11 = vld [vmem:[%s1593_s26 + $0x58] sm:$0xff]  ;;  %v1284_v12 = vld [vmem:[%s1565_s19 + $0x40] sm:$0xf]  ;;  %v1374_v13 = vld [vmem:[%s1565_s19 + $0x44] sm:$0xf0] }
  0x1d   : > { %812 = vmatpush.msrb.mxu3 %v617_v10  ;;  %v1373_v14 = vld [vmem:[%s1565_s19 + $0x44] sm:$0xf]  ;;  %v1286_v15 = vld [vmem:[%s1565_s19 + $0x48] sm:$0xf0]  ;;  %v1285_v16 = vor.u32 %v1374_v13, %v1284_v12  ;;  %v1292_v20 = vld [vmem:[%s1565_s19 + $0x50] sm:$0xf] }
  0x1e   : > { %523 = vmatpush.bf16.msra.mxu0 %v426_v29  ;;  %v1289_v17 = vor.u32 %v1373_v14, %v1286_v15  ;;  %v630_v18 = vld [vmem:[%s1593_s26 + $0x60] sm:$0xff]  ;;  %v631_v19 = vld [vmem:[%s1593_s26 + $0x68] sm:$0xff]  ;;  %v1376_v21 = vld [vmem:[%s1565_s19 + $0x54] sm:$0xf0] }
  0x1f   : > { %572 = vmatpush.bf16.msra.mxu1 %v434_v30  ;;  %v1375_v22 = vld [vmem:[%s1565_s19 + $0x54] sm:$0xf]  ;;  %v1294_v23 = vld [vmem:[%s1565_s19 + $0x58] sm:$0xf0]  ;;  %v1293_v24 = vor.u32 %v1376_v21, %v1292_v20  ;;  %v1300_v28 = vld [vmem:[%s1565_s19 + $0x60] sm:$0xf] }
  0x20   : > { %v1297_v25 = vor.u32 %v1375_v22, %v1294_v23  ;;  %v632_v26 = vld [vmem:[%s1593_s26 + $0x70] sm:$0xff]  ;;  %v1378_v29 = vld [vmem:[%s1565_s19 + $0x64] sm:$0xf0]  ;;  %v1377_v30 = vld [vmem:[%s1565_s19 + $0x64] sm:$0xf] }
  0x21   : > { %v1302_v31 = vld [vmem:[%s1565_s19 + $0x68] sm:$0xf0]  ;;  %v1301_v32 = vor.u32 %v1378_v29, %v1300_v28  ;;  %v1308_v34 = vld [vmem:[%s1565_s19 + $0x70] sm:$0xf]  ;;  %v1310_v37 = vld [vmem:[%s1565_s19 + $0x78] sm:$0xf0] }
  0x22   : > { %524 = vmatpush.bf16.msra.mxu0 %v425_v35  ;;  %v1305_v33 = vor.u32 %v1377_v30, %v1302_v31  ;;  %v1380_v35 = vld [vmem:[%s1565_s19 + $0x74] sm:$0xf0]  ;;  %v619_v43 = vld [vmem:[%s1593_s26 + $0x8] sm:$0xff]  ;;  %v622_v45 = vld [vmem:[%s1593_s26 + $0x20] sm:$0xff] }
  0x23   : > { %573 = vmatpush.bf16.msra.mxu1 %v433_v36  ;;  %v1379_v36 = vld [vmem:[%s1565_s19 + $0x74] sm:$0xf]  ;;  %v1309_v38 = vor.u32 %v1380_v35, %v1308_v34  ;;  %1318 = vmatmul.msk.f32.vlgmr.msra.gmra.mxu2 %vm635_vm0, %v622_v45  ;;  %v626_v63 = vld [vmem:[%s1593_s26 + $0x40] sm:$0xff]  ;;  %v627_v3 = vld [vmem:[%s1593_s26 + $0x48] sm:$0xff] }
  0x24   : > { %1325 = vmatmul.msk.f32.gmra.mxu3 %vm635_vm0, %v629_v11  ;;  %v1313_v39 = vor.u32 %v1379_v36, %v1310_v37  ;;  %v620_v48 = vld [vmem:[%s1593_s26 + $0x10] sm:$0xff]  ;;  %v901_v10 = vld [vmem:[%s1851_s6 + $0x18] sm:$0xff]  ;;  %v899_v22 = vld [vmem:[%s1851_s6 + $0x8] sm:$0xff] }
  0x25   : > { %v624_v55 = vld [vmem:[%s1593_s26 + $0x30] sm:$0xff]  ;;  %963 = vmatpush.msrb.mxu2 %v901_v10 }
  0x26   : > { %525 = vmatpush.bf16.msra.mxu0 %v424_v41  ;;  %v618_v41 = vld [vmem:[%s1593_s26] sm:$0xff] }
  0x27   : > { %574 = vmatpush.bf16.msra.mxu1 %v432_v42 }
  0x2a   : > { %526 = vmatpush.bf16.msra.mxu0 %v423_v47 }
  0x2b   : > { %575 = vmatpush.bf16.msra.mxu1 %v431_v50  ;;  %v623_v50 = vld [vmem:[%s1593_s26 + $0x28] sm:$0xff] }
  0x2c   : > { %1326 = vmatmul.msk.f32.gmra.mxu3 %vm635_vm0, %v630_v18  ;;  %1319 = vmatmul.msk.f32.gmra.mxu2 %vm635_vm0, %v623_v50 }
  0x2d   : > { %527 = vmatmul.bf16.vlgmr.msra.gmra.mxu0 %v1253_v53  ;;  %v621_v53 = vld [vmem:[%s1593_s26 + $0x18] sm:$0xff] }
  0x2e   : > { %699 = vmatpush.msrb.mxu0 %v634_v27  ;;  %576 = vmatmul.bf16.vlgmr.msra.gmra.mxu1 %v1257_v54 }
  0x2f   : > { %1381 = vmatpush.msrb.mxu1 %v634_v27  ;;  %v633_v27 = vld [vmem:[%s1593_s26 + $0x78] sm:$0xff] }
  0x34   : > { %1327 = vmatmul.msk.f32.gmra.mxu3 %vm635_vm0, %v631_v19  ;;  %1320 = vmatmul.msk.f32.gmra.mxu2 %vm635_vm0, %v624_v55 }
  0x3c   : > { %1328 = vmatmul.msk.f32.gmra.mxu3 %vm635_vm0, %v632_v26 }
  0x3d   : > { %532 = vmatmul.bf16.gmra.mxu0 %v1261_v59  ;;  %v625_v59 = vld [vmem:[%s1593_s26 + $0x38] sm:$0xff]  ;;  %s1405_s26 = smov 120  }
  0x3e   : > { %581 = vmatmul.bf16.gmra.mxu1 %v1265_v60  ;;  %1321 = vmatmul.msk.f32.gmra.mxu2 %vm635_vm0, %v625_v59 }
  0x44   : > { %1329 = vmatmul.msk.f32.gmra.mxu3 %vm635_vm0, %v633_v27  ;;  %v898_v27 = vld [vmem:[%s1851_s6] sm:$0xff] }
  0x46   : > { %1322 = vmatmul.msk.f32.gmra.mxu2 %vm635_vm0, %v626_v63 }
  0x4d   : > { %537 = vmatmul.bf16.gmra.mxu0 %v1269_v1 }
  0x4e   : > { %586 = vmatmul.bf16.gmra.mxu1 %v1273_v2  ;;  %1323 = vmatmul.msk.f32.gmra.mxu2 %vm635_vm0, %v627_v3 }
  0x5d   : > { %542 = vmatmul.bf16.gmra.mxu0 %v1277_v7 }
  0x5e   : > { %591 = vmatmul.bf16.gmra.mxu1 %v1281_v8 }
  0x6d   : > { %547 = vmatmul.bf16.gmra.mxu0 %v1285_v16 }
  0x6e   : > { %596 = vmatmul.bf16.gmra.mxu1 %v1289_v17  ;;  %v900_v17 = vld [vmem:[%s1851_s6 + $0x10] sm:$0xff] }
  0x6f   : > { %964 = vmatpush.msrb.mxu2 %v900_v17 }
  0x71   : > { %965 = vmatpush.msrb.mxu2 %v899_v22 }
  0x73   : > { %966 = vmatpush.msrb.mxu2 %v898_v27 }
  0x7d   : > { %552 = vmatmul.bf16.gmra.mxu0 %v1293_v24 }
  0x7e   : > { %601 = vmatmul.bf16.gmra.mxu1 %v1297_v25 }
  0x8d   : > { %557 = vmatmul.bf16.gmra.mxu0 %v1301_v32 }
  0x8e   : > { %606 = vmatmul.bf16.gmra.mxu1 %v1305_v33 }
  0x9d   : > { %562 = vmatmul.bf16.gmra.mxu0 %v1309_v38 }
  0x9e   : > { %611 = vmatmul.bf16.gmra.mxu1 %v1313_v39 }
  0x9f   : > { %v1661_v18 = vpop.f32.mrf.mxu3 }
  0xa7   : > { %v1668_v23 = vpop.f32.mrf.mxu3 }
  0xaa   : > { %v528_v40 = vpop.f32.mrf.mxu0 }
  0xab   : > { %v577_v42 = vpop.f32.mrf.mxu1 }
  0xac   : > { %v578_v44 = vadd.f32 %v577_v42, %v528_v40 }
  0xad   : > { %1314 = vmatmul.msk.f32.vlgmr.msrb.gmra.mxu0 %vm635_vm0, %v618_v41 }
  0xae   : > { %1330 = vmatmul.msk.f32.vlgmr.msrb.gmra.mxu3 %vm635_vm0, %v578_v44  ;;  %1315 = vmatmul.msk.f32.vlgmr.msrb.gmra.mxu1 %vm635_vm0, %v619_v43  ;;  %v1395_v44 = vld [vmem:[%s1852_s7] ss:$0 sm:$0xff] }
  0xaf   : > { %v1674_v28 = vpop.f32.mrf.mxu3  ;;  %1035 = vrot.lane.b32.xlu0 %v1395_v44, %s1404_s24 }
  0xb2   : > { %v530_v46 = vpop.f32.mrf.mxu0 }
  0xb3   : > { %v579_v47 = vpop.f32.mrf.mxu1 }
  0xb4   : > { %v580_v49 = vadd.f32 %v579_v47, %v530_v46  ;;  %v1692_v46 = vld [vmem:[%s1850_s5] ss:$0 sm:$0xff] }
  0xb6   : > { %1331 = vmatmul.msk.f32.gmra.mxu3 %vm635_vm0, %v580_v49  ;;  %1316 = vmatmul.msk.f32.gmra.mxu1 %vm635_vm0, %v620_v48 }
  0xb7   : > { %v1677_v34 = vpop.f32.mrf.mxu3 }
  0xba   : > { %v533_v51 = vpop.f32.mrf.mxu0 }
  0xbb   : > { %v582_v52 = vpop.f32.mrf.mxu1 }
  0xbc   : > { %v583_v54 = vadd.f32 %v582_v52, %v533_v51 }
  0xbe   : > { %1332 = vmatmul.msk.f32.gmra.mxu3 %vm635_vm0, %v583_v54  ;;  %1317 = vmatmul.msk.f32.gmra.mxu1 %vm635_vm0, %v621_v53 }
  0xbf   : > { %v1680_v39 = vpop.f32.mrf.mxu3 }
  0xc2   : > { %v535_v56 = vpop.f32.mrf.mxu0 }
  0xc3   : > { %v584_v57 = vpop.f32.mrf.mxu1 }
  0xc4   : > { %v585_v58 = vadd.f32 %v584_v57, %v535_v56 }
  0xc6   : > { %1333 = vmatmul.msk.f32.gmra.mxu3 %vm635_vm0, %v585_v58 }
  0xc7   : > { %v1684_v43 = vpop.f32.mrf.mxu3 }
  0xca   : > { %v538_v60 = vpop.f32.mrf.mxu0 }
  0xcb   : > { %v587_v61 = vpop.f32.mrf.mxu1 }
  0xcc   : > { %v588_v62 = vadd.f32 %v587_v61, %v538_v60  ;;  %v713_v60 = vpop.f32.mrf.mxu2 }
  0xce   : > { %1334 = vmatmul.msk.f32.gmra.mxu3 %vm635_vm0, %v588_v62 }
  0xd2   : > { %v540_v0 = vpop.f32.mrf.mxu0 }
  0xd3   : > { %v589_v1 = vpop.f32.mrf.mxu1 }
  0xd4   : > { %v590_v2 = vadd.f32 %v589_v1, %v540_v0  ;;  %v716_v3 = vpop.f32.mrf.mxu2 }
  0xd6   : > { %1335 = vmatmul.msk.f32.gmra.mxu3 %vm635_vm0, %v590_v2 }
  0xda   : > { %v543_v4 = vpop.f32.mrf.mxu0 }
  0xdb   : > { %v592_v5 = vpop.f32.mrf.mxu1 }
  0xdc   : > { %v593_v6 = vadd.f32 %v592_v5, %v543_v4 }
  0xde   : > { %1336 = vmatmul.msk.f32.gmra.mxu3 %vm635_vm0, %v593_v6 }
  0xe2   : > { %v545_v7 = vpop.f32.mrf.mxu0 }
  0xe3   : > { %v594_v8 = vpop.f32.mrf.mxu1 }
  0xe4   : > { %v595_v9 = vadd.f32 %v594_v8, %v545_v7 }
  0xe6   : > { %1337 = vmatmul.msk.f32.gmra.mxu3 %vm635_vm0, %v595_v9  ;;  %v719_v9 = vpop.f32.mrf.mxu2 }
  0xea   : > { %v548_v11 = vpop.f32.mrf.mxu0 }
  0xeb   : > { %v597_v12 = vpop.f32.mrf.mxu1 }
  0xec   : > { %v598_v13 = vadd.f32 %v597_v12, %v548_v11 }
  0xee   : > { %1338 = vmatmul.msk.f32.gmra.mxu3 %vm635_vm0, %v598_v13 }
  0xf2   : > { %v550_v14 = vpop.f32.mrf.mxu0 }
  0xf3   : > { %v599_v15 = vpop.f32.mrf.mxu1 }
  0xf4   : > { %v600_v16 = vadd.f32 %v599_v15, %v550_v14  ;;  %v722_v15 = vpop.f32.mrf.mxu2 }
  0xf6   : > { %1339 = vmatmul.msk.f32.gmra.mxu3 %vm635_vm0, %v600_v16 }
  0xfa   : > { %v553_v19 = vpop.f32.mrf.mxu0 }
  0xfb   : > { %v602_v20 = vpop.f32.mrf.mxu1 }
  0xfc   : > { %v603_v21 = vadd.f32 %v602_v20, %v553_v19  ;;  %v725_v22 = vpop.f32.mrf.mxu2 }
  0xfe   : > { %1340 = vmatmul.msk.f32.gmra.mxu3 %vm635_vm0, %v603_v21 }
 0x102   : > { %v555_v24 = vpop.f32.mrf.mxu0 }
 0x103   : > { %v604_v25 = vpop.f32.mrf.mxu1 }
 0x104   : > { %v605_v26 = vadd.f32 %v604_v25, %v555_v24 }
 0x106   : > { %1341 = vmatmul.msk.f32.gmra.mxu3 %vm635_vm0, %v605_v26 }
 0x10a   : > { %v558_v29 = vpop.f32.mrf.mxu0 }
 0x10b   : > { %v607_v30 = vpop.f32.mrf.mxu1 }
 0x10c   : > { %v608_v31 = vadd.f32 %v607_v30, %v558_v29  ;;  %v728_v30 = vpop.f32.mrf.mxu2 }
 0x10e   : > { %1342 = vmatmul.msk.f32.gmra.mxu3 %vm635_vm0, %v608_v31 }
 0x112   : > { %v560_v32 = vpop.f32.mrf.mxu0 }
 0x113   : > { %v609_v33 = vpop.f32.mrf.mxu1 }
 0x114   : > { %v610_v35 = vadd.f32 %v609_v33, %v560_v32 }
 0x116   : > { %1343 = vmatmul.msk.f32.gmra.mxu3 %vm635_vm0, %v610_v35 }
 0x11a   : > { %v563_v36 = vpop.f32.mrf.mxu0 }
 0x11b   : > { %v612_v37 = vpop.f32.mrf.mxu1 }
 0x11c   : > { %v613_v38 = vadd.f32 %v612_v37, %v563_v36 }
 0x11e   : > { %1344 = vmatmul.msk.f32.gmra.mxu3 %vm635_vm0, %v613_v38 }
 0x122   : > { %v565_v40 = vpop.f32.mrf.mxu0 }
 0x123   : > { %v614_v41 = vpop.f32.mrf.mxu1 }
 0x124   : > { %v615_v42 = vadd.f32 %v614_v41, %v565_v40 }
 0x126   : > { %1345 = vmatmul.msk.f32.gmra.mxu3 %vm635_vm0, %v615_v42 }
 0x12a   : > { %v701_v45 = vpop.f32.mrf.mxu0 }
 0x12b   : > { %v704_v49 = vpop.f32.mrf.mxu1 }
 0x131   : > { %v814_v47 = vpop.f32.mrf.mxu3 }
 0x132   : > { %v815_v48 = vadd.f32 %v814_v47, %v701_v45 }
 0x133   : > { %v707_v55 = vpop.f32.mrf.mxu1 }
 0x134   : > { %v866_v50 = vadd.f32 %v1692_v46, %v815_v48 }
 0x136   : > { %v882_v51 = vmax.f32 %v866_v50, 0.0 }
 0x138   : > { %1346 = vmatmul.msk.f32.vlgmr.msrb.gmra.mxu2 %vm902_vm1, %v882_v51 }
 0x139   : > { %v817_v52 = vpop.f32.mrf.mxu3 }
 0x13a   : > { %v818_v53 = vadd.f32 %v817_v52, %v704_v49 }
 0x13b   : > { %v710_v62 = vpop.f32.mrf.mxu1 }
 0x13c   : > { %v867_v54 = vadd.f32 %v1692_v46, %v818_v53 }
 0x13e   : > { %v883_v56 = vmax.f32 %v867_v54, 0.0 }
 0x140   : > { %1347 = vmatmul.msk.f32.gmra.mxu2 %vm902_vm1, %v883_v56 }
 0x141   : > { %v820_v57 = vpop.f32.mrf.mxu3 }
 0x142   : > { %v821_v58 = vadd.f32 %v820_v57, %v707_v55 }
 0x144   : > { %v868_v59 = vadd.f32 %v1692_v46, %v821_v58 }
 0x146   : > { %v884_v61 = vmax.f32 %v868_v59, 0.0 }
 0x148   : > { %1348 = vmatmul.msk.f32.gmra.mxu2 %vm902_vm1, %v884_v61 }
 0x149   : > { %v823_v63 = vpop.f32.mrf.mxu3 }
 0x14a   : > { %v824_v0 = vadd.f32 %v823_v63, %v710_v62 }
 0x14c   : > { %v869_v1 = vadd.f32 %v1692_v46, %v824_v0 }
 0x14e   : > { %v885_v2 = vmax.f32 %v869_v1, 0.0 }
 0x150   : > { %1349 = vmatmul.msk.f32.gmra.mxu2 %vm902_vm1, %v885_v2 }
 0x151   : > { %v826_v4 = vpop.f32.mrf.mxu3 }
 0x152   : > { %v827_v5 = vadd.f32 %v826_v4, %v713_v60 }
 0x154   : > { %v870_v6 = vadd.f32 %v1692_v46, %v827_v5 }
 0x156   : > { %v886_v7 = vmax.f32 %v870_v6, 0.0 }
 0x158   : > { %1350 = vmatmul.msk.f32.gmra.mxu2 %vm902_vm1, %v886_v7 }
 0x159   : > { %v829_v8 = vpop.f32.mrf.mxu3 }
 0x15a   : > { %v830_v10 = vadd.f32 %v829_v8, %v716_v3 }
 0x15c   : > { %v871_v11 = vadd.f32 %v1692_v46, %v830_v10 }
 0x15e   : > { %v887_v12 = vmax.f32 %v871_v11, 0.0 }
 0x160   : > { %1351 = vmatmul.msk.f32.gmra.mxu2 %vm902_vm1, %v887_v12 }
 0x161   : > { %v832_v13 = vpop.f32.mrf.mxu3 }
 0x162   : > { %v833_v14 = vadd.f32 %v832_v13, %v719_v9 }
 0x164   : > { %v872_v16 = vadd.f32 %v1692_v46, %v833_v14 }
 0x166   : > { %v888_v17 = vmax.f32 %v872_v16, 0.0 }
 0x168   : > { %1352 = vmatmul.msk.f32.gmra.mxu2 %vm902_vm1, %v888_v17 }
 0x169   : > { %v835_v19 = vpop.f32.mrf.mxu3 }
 0x16a   : > { %v836_v20 = vadd.f32 %v835_v19, %v722_v15 }
 0x16c   : > { %v873_v21 = vadd.f32 %v1692_v46, %v836_v20 }
 0x16e   : > { %v889_v24 = vmax.f32 %v873_v21, 0.0 }
 0x170   : > { %1353 = vmatmul.msk.f32.gmra.mxu2 %vm902_vm1, %v889_v24 }
 0x171   : > { %v838_v25 = vpop.f32.mrf.mxu3 }
 0x172   : > { %v839_v26 = vadd.f32 %v838_v25, %v725_v22 }
 0x174   : > { %v874_v27 = vadd.f32 %v1692_v46, %v839_v26 }
 0x176   : > { %v890_v29 = vmax.f32 %v874_v27, 0.0 }
 0x178   : > { %1354 = vmatmul.msk.f32.gmra.mxu2 %vm902_vm1, %v890_v29 }
 0x179   : > { %v841_v31 = vpop.f32.mrf.mxu3 }
 0x17a   : > { %v842_v32 = vadd.f32 %v841_v31, %v728_v30 }
 0x17c   : > { %v875_v33 = vadd.f32 %v1692_v46, %v842_v32 }
 0x17e   : > { %v891_v35 = vmax.f32 %v875_v33, 0.0 }
 0x180   : > { %1355 = vmatmul.msk.f32.gmra.mxu2 %vm902_vm1, %v891_v35 }
 0x181   : > { %v844_v36 = vpop.f32.mrf.mxu3 }
 0x182   : > { %v845_v37 = vadd.f32 %v844_v36, %v1661_v18 }
 0x184   : > { %v876_v38 = vadd.f32 %v1692_v46, %v845_v37 }
 0x186   : > { %v892_v40 = vmax.f32 %v876_v38, 0.0 }
 0x188   : > { %1356 = vmatmul.msk.f32.gmra.mxu2 %vm902_vm1, %v892_v40 }
 0x189   : > { %v847_v41 = vpop.f32.mrf.mxu3 }
 0x18a   : > { %v848_v42 = vadd.f32 %v847_v41, %v1668_v23 }
 0x18c   : > { %v877_v44 = vadd.f32 %v1692_v46, %v848_v42 }
 0x18e   : > { %v893_v45 = vmax.f32 %v877_v44, 0.0 }
 0x190   : > { %1357 = vmatmul.msk.f32.gmra.mxu2 %vm902_vm1, %v893_v45 }
 0x191   : > { %v850_v47 = vpop.f32.mrf.mxu3 }
 0x192   : > { %v851_v48 = vadd.f32 %v850_v47, %v1674_v28 }
 0x194   : > { %v878_v49 = vadd.f32 %v1692_v46, %v851_v48 }
 0x196   : > { %v894_v50 = vmax.f32 %v878_v49, 0.0 }
 0x198   : > { %1358 = vmatmul.msk.f32.gmra.mxu2 %vm902_vm1, %v894_v50 }
 0x199   : > { %v853_v18 = vpop.f32.mrf.mxu3 }
 0x19a   : > { %v854_v51 = vadd.f32 %v853_v18, %v1677_v34  ;;  %v1732_v34 = vpop.permute.xlu0 %1035 }
 0x19c   : > { %v879_v52 = vadd.f32 %v1692_v46, %v854_v51 }
 0x19e   : > { %v895_v23 = vmax.f32 %v879_v52, 0.0 }
 0x1a0   : > { %1359 = vmatmul.msk.f32.gmra.mxu2 %vm902_vm1, %v895_v23 }
 0x1a1   : > { %v856_v53 = vpop.f32.mrf.mxu3 }
 0x1a2   : > { %v857_v54 = vadd.f32 %v856_v53, %v1680_v39 }
 0x1a4   : > { %v880_v55 = vadd.f32 %v1692_v46, %v857_v54 }
 0x1a6   : > { %v896_v28 = vmax.f32 %v880_v55, 0.0 }
 0x1a8   : > { %1360 = vmatmul.msk.f32.gmra.mxu2 %vm902_vm1, %v896_v28 }
 0x1a9   : > { %v859_v56 = vpop.f32.mrf.mxu3 }
 0x1aa   : > { %v860_v57 = vadd.f32 %v859_v56, %v1684_v43 }
 0x1ac   : > { %v881_v58 = vadd.f32 %v1692_v46, %v860_v57 }
 0x1ae   : > { %v897_v59 = vmax.f32 %v881_v58, 0.0 }
 0x1b0   : > { %1361 = vmatmul.msk.f32.gmra.mxu2 %vm902_vm1, %v897_v59 }
 0x1bb   : > { %v968_v39 = vpop.f32.mrf.mxu2 }
 0x1bc   : > { %1016 = vst.msk [vmem:[%s1738_s25] sm:$0xff] %vm635_vm0, %v968_v39  ;;  %v1038_v43 = vadd.f32 %v1732_v34, %v968_v39 }
 0x1be   : > { %1070 = vrot.lane.b32.xlu0 %v1038_v43, %s1405_s26 }
 0x1c3   : > { %v971_v46 = vpop.f32.mrf.mxu2 }
 0x1c4   : > { %1017 = vst.msk [vmem:[%s1738_s25 + $0x8] sm:$0xff] %vm635_vm0, %v971_v46  ;;  %v1039_v60 = vadd.f32 %v1732_v34, %v971_v46 }
 0x1c6   : > { %1072 = vrot.lane.b32.xlu1 %v1039_v60, %s1405_s26 }
 0x1cb   : > { %v974_v61 = vpop.f32.mrf.mxu2 }
 0x1cc   : > { %1018 = vst.msk [vmem:[%s1738_s25 + $0x10] sm:$0xff] %vm635_vm0, %v974_v61  ;;  %v1040_v62 = vadd.f32 %v1732_v34, %v974_v61 }
 0x1ce   : > { %1074 = vrot.lane.b32.xlu1 %v1040_v62, %s1405_s26 }
 0x1d3   : > { %v977_v63 = vpop.f32.mrf.mxu2 }
 0x1d4   : > { %1019 = vst.msk [vmem:[%s1738_s25 + $0x18] sm:$0xff] %vm635_vm0, %v977_v63  ;;  %v1041_v0 = vadd.f32 %v1732_v34, %v977_v63 }
 0x1d6   : > { %1076 = vrot.lane.b32.xlu2 %v1041_v0, %s1405_s26 }
 0x1db   : > { %v980_v1 = vpop.f32.mrf.mxu2 }
 0x1dc   : > { %1020 = vst.msk [vmem:[%s1738_s25 + $0x20] sm:$0xff] %vm635_vm0, %v980_v1  ;;  %v1042_v2 = vadd.f32 %v1732_v34, %v980_v1 }
 0x1de   : > { %1078 = vrot.lane.b32.xlu2 %v1042_v2, %s1405_s26 }
 0x1e3   : > { %v983_v3 = vpop.f32.mrf.mxu2 }
 0x1e4   : > { %1021 = vst.msk [vmem:[%s1738_s25 + $0x28] sm:$0xff] %vm635_vm0, %v983_v3  ;;  %v1043_v4 = vadd.f32 %v1732_v34, %v983_v3 }
 0x1e6   : > { %1080 = vrot.lane.b32.xlu0 %v1043_v4, %s1405_s26 }
 0x1eb   : > { %v986_v5 = vpop.f32.mrf.mxu2 }
 0x1ec   : > { %1022 = vst.msk [vmem:[%s1738_s25 + $0x30] sm:$0xff] %vm635_vm0, %v986_v5  ;;  %v1044_v6 = vadd.f32 %v1732_v34, %v986_v5 }
 0x1ee   : > { %1082 = vrot.lane.b32.xlu1 %v1044_v6, %s1405_s26 }
 0x1f3   : > { %v989_v7 = vpop.f32.mrf.mxu2 }
 0x1f4   : > { %1023 = vst.msk [vmem:[%s1738_s25 + $0x38] sm:$0xff] %vm635_vm0, %v989_v7  ;;  %v1045_v8 = vadd.f32 %v1732_v34, %v989_v7 }
 0x1f6   : > { %1084 = vrot.lane.b32.xlu2 %v1045_v8, %s1405_s26 }
 0x1fb   : > { %v992_v9 = vpop.f32.mrf.mxu2 }
 0x1fc   : > { %1024 = vst.msk [vmem:[%s1738_s25 + $0x40] sm:$0xff] %vm635_vm0, %v992_v9  ;;  %v1046_v10 = vadd.f32 %v1732_v34, %v992_v9 }
 0x1fe   : > { %1086 = vrot.lane.b32.xlu0 %v1046_v10, %s1405_s26 }
 0x203   : > { %v995_v11 = vpop.f32.mrf.mxu2 }
 0x204   : > { %1025 = vst.msk [vmem:[%s1738_s25 + $0x48] sm:$0xff] %vm635_vm0, %v995_v11  ;;  %v1047_v12 = vadd.f32 %v1732_v34, %v995_v11 }
 0x206   : > { %1088 = vrot.lane.b32.xlu1 %v1047_v12, %s1405_s26 }
 0x20b   : > { %v998_v13 = vpop.f32.mrf.mxu2 }
 0x20c   : > { %1026 = vst.msk [vmem:[%s1738_s25 + $0x50] sm:$0xff] %vm635_vm0, %v998_v13  ;;  %v1048_v14 = vadd.f32 %v1732_v34, %v998_v13 }
 0x20e   : > { %1090 = vrot.lane.b32.xlu2 %v1048_v14, %s1405_s26 }
 0x213   : > { %v1001_v15 = vpop.f32.mrf.mxu2 }
 0x214   : > { %1027 = vst.msk [vmem:[%s1738_s25 + $0x58] sm:$0xff] %vm635_vm0, %v1001_v15  ;;  %v1049_v16 = vadd.f32 %v1732_v34, %v1001_v15 }
 0x216   : > { %1092 = vrot.lane.b32.xlu0 %v1049_v16, %s1405_s26 }
 0x21b   : > { %v1004_v17 = vpop.f32.mrf.mxu2 }
 0x21c   : > { %1028 = vst.msk [vmem:[%s1738_s25 + $0x60] sm:$0xff] %vm635_vm0, %v1004_v17  ;;  %v1050_v19 = vadd.f32 %v1732_v34, %v1004_v17 }
 0x21e   : > { %1094 = vrot.lane.b32.xlu1 %v1050_v19, %s1405_s26 }
 0x223   : > { %v1007_v20 = vpop.f32.mrf.mxu2 }
 0x224   : > { %1029 = vst.msk [vmem:[%s1738_s25 + $0x68] sm:$0xff] %vm635_vm0, %v1007_v20  ;;  %v1051_v21 = vadd.f32 %v1732_v34, %v1007_v20 }
 0x226   : > { %1096 = vrot.lane.b32.xlu2 %v1051_v21, %s1405_s26 }
 0x22b   : > { %v1010_v22 = vpop.f32.mrf.mxu2 }
 0x22c   : > { %1030 = vst.msk [vmem:[%s1738_s25 + $0x70] sm:$0xff] %vm635_vm0, %v1010_v22  ;;  %v1052_v24 = vadd.f32 %v1732_v34, %v1010_v22 }
 0x22e   : > { %1098 = vrot.lane.b32.xlu0 %v1052_v24, %s1405_s26 }
 0x230   : > { %v1071_v25 = vpop.permute.xlu0 %1070  ;;  %v1077_v26 = vpop.permute.xlu2 %1076 }
 0x231   : > { %1118 = vst.msk [vmem:[%s1804_s29] sm:$0xff] %vm635_vm0, %v1071_v25 }
 0x232   : > { %1121 = vst.msk [vmem:[%s1804_s29 + $0x18] sm:$0xff] %vm635_vm0, %v1077_v26 }
 0x233   : > { %v1013_v27 = vpop.f32.mrf.mxu2 }
 0x234   : > { %1031 = vst.msk [vmem:[%s1738_s25 + $0x78] sm:$0xff] %vm635_vm0, %v1013_v27  ;;  %v1053_v29 = vadd.f32 %v1732_v34, %v1013_v27 }
 0x236   : > { %1100 = vrot.lane.b32.xlu1 %v1053_v29, %s1405_s26 }
 0x238   : > { %v1073_v30 = vpop.permute.xlu1 %1072  ;;  %v1079_v31 = vpop.permute.xlu2 %1078 }
 0x239   : > { %1119 = vst.msk [vmem:[%s1804_s29 + $0x8] sm:$0xff] %vm635_vm0, %v1073_v30 }
 0x23a   : > { %1122 = vst.msk [vmem:[%s1804_s29 + $0x20] sm:$0xff] %vm635_vm0, %v1079_v31 }
 0x240   : > { %v1075_v32 = vpop.permute.xlu1 %1074 }
 0x241   : > { %1120 = vst.msk [vmem:[%s1804_s29 + $0x10] sm:$0xff] %vm635_vm0, %v1075_v32 }
 0x250   : > { %v1085_v33 = vpop.permute.xlu2 %1084 }
 0x251   : > { %1125 = vst.msk [vmem:[%s1804_s29 + $0x38] sm:$0xff] %vm635_vm0, %v1085_v33 }
 0x258   : > { %v1081_v35 = vpop.permute.xlu0 %1080 }
 0x259   : > { %1123 = vst.msk [vmem:[%s1804_s29 + $0x28] sm:$0xff] %vm635_vm0, %v1081_v35 }
 0x260   : > { %v1083_v36 = vpop.permute.xlu1 %1082 }
 0x261   : > { %1124 = vst.msk [vmem:[%s1804_s29 + $0x30] sm:$0xff] %vm635_vm0, %v1083_v36 }
 0x268   : > { %v1091_v37 = vpop.permute.xlu2 %1090 }
 0x269   : > { %1128 = vst.msk [vmem:[%s1804_s29 + $0x50] sm:$0xff] %vm635_vm0, %v1091_v37 }
 0x270   : > { %v1087_v38 = vpop.permute.xlu0 %1086 }
 0x271   : > { %1126 = vst.msk [vmem:[%s1804_s29 + $0x40] sm:$0xff] %vm635_vm0, %v1087_v38 }
 0x278   : > { %v1089_v40 = vpop.permute.xlu1 %1088 }
 0x279   : > { %1127 = vst.msk [vmem:[%s1804_s29 + $0x48] sm:$0xff] %vm635_vm0, %v1089_v40 }
 0x280   : > { %v1097_v41 = vpop.permute.xlu2 %1096 }
 0x281   : > { %1131 = vst.msk [vmem:[%s1804_s29 + $0x68] sm:$0xff] %vm635_vm0, %v1097_v41 }
 0x288   : > { %v1093_v42 = vpop.permute.xlu0 %1092 }
 0x289   : > { %1129 = vst.msk [vmem:[%s1804_s29 + $0x58] sm:$0xff] %vm635_vm0, %v1093_v42 }
 0x290   : > { %v1095_v44 = vpop.permute.xlu1 %1094 }
 0x291   : > { %1130 = vst.msk [vmem:[%s1804_s29 + $0x60] sm:$0xff] %vm635_vm0, %v1095_v44 }
 0x2a0   : > { %v1099_v45 = vpop.permute.xlu0 %1098 }
 0x2a1   : > { %1132 = vst.msk [vmem:[%s1804_s29 + $0x70] sm:$0xff] %vm635_vm0, %v1099_v45 }
 0x2a8   : > { %v1101_v47 = vpop.permute.xlu1 %1100 }
 0x2a9   : > { %1133 = vst.msk [vmem:[%s1804_s29 + $0x78] sm:$0xff] %vm635_vm0, %v1101_v47 }
 0x2aa PF: > { %s20_s30 = sadd.s32 1, %s1402_s30  }
 0x2ab   : > { %p17_p4 = scmp.ge.s32.totalorder %s20_s30, 4  }
 0x2ad   :  { %19 = sbr.rel (!%p17_p4) target bundleno = 1 (0x1), region = 97 }

</bundles_post_ra>
